<compile_context>
chip_gen: v7x
topology: tpu7x:2x2x1
jax: 0.10.0
libtpu: 0.0.40
codegen_flags: <defaults>
</compile_context>

<pallas_src>
import math

import jax
import jax.numpy as jnp
from jax import lax
from jax.experimental import pallas as pl
from jax.experimental.pallas import tpu as pltpu
import numpy as np

# ---------------- model hyper-params (small, consistent with the module) ----
B = 2          # batch
S = 8          # sequence length
D_MODEL = 32   # d_model
NUM_HEADS = 4
D_K = D_MODEL // NUM_HEADS
D_FF = 64
EPS = 1e-5
INV_SCALE = 1.0 / math.sqrt(D_K)

BS = B * S                    # flattened batch*seq rows (16)
HBS = NUM_HEADS * B * S       # rows of the head-packed K/V layout (64)
LANE = 128                    # one lane tile; Q/K/V each padded to this width


def _layernorm(h, gamma, beta):
    # two-pass (centered) variance: numerically robust, same reduction count
    mean = jnp.mean(h, axis=-1, keepdims=True)
    c = h - mean
    var = jnp.mean(c * c, axis=-1, keepdims=True)
    return c * lax.rsqrt(var + EPS) * gamma + beta


def transformer_block_kernel(x_ref, wqkv_ref, wo_ref, w1_ref, w2_ref,
                             vec_ref, rmat_ref, hmask_ref, gones_ref,
                             bbias_ref, o_ref):
    x = x_ref[...]                                           # (BS, D)

    # ---- packed small parameter vectors (one slab, row/lane slices) -------
    bqkv = vec_ref[0:1, :]                                   # (1, 3*LANE), q-scaled
    bo = vec_ref[1:2, :D_MODEL]
    b1 = vec_ref[2:3, :D_FF]
    b2 = vec_ref[3:4, :D_MODEL]
    g1 = vec_ref[4:5, :D_MODEL]
    be1 = vec_ref[5:6, :D_MODEL]
    g2 = vec_ref[6:7, :D_MODEL]
    be2 = vec_ref[7:8, :D_MODEL]

    # ---- fused QKV projection (one MXU matmul, 1/sqrt(dk) pre-folded) ------
    # Q, K, V each live in their own 128-lane tile -> whole-tile slices.
    qkv = jnp.dot(x, wqkv_ref[...], preferred_element_type=jnp.float32) + bqkv
    q = qkv[:, 0:LANE]                                       # (BS, 128), cols >=32 zero
    kv = qkv[:, LANE:3 * LANE]                               # (BS, 256)  = [K | V] tiles

    # ---- replicate K/V rows for every head with one matmul + one mask ------
    # Head-packed layout: row r = h*(B*S) + b*S + j of k_pack holds k[b, j, :]
    # masked to the d_k columns of head h.  rmat is a constant 0/1 (HBS, BS)
    # replication matrix, hmask a constant (HBS, 2*LANE) per-head column mask.
    kv_pack = jnp.dot(rmat_ref[...], kv,
                      preferred_element_type=jnp.float32) * hmask_ref[...]
    k_pack = kv_pack[:, 0:LANE]                              # (HBS, 128)
    v_pack = kv_pack[:, LANE:2 * LANE]                       # (HBS, 128)

    # ---- all-head scores in one matmul; additive bias masks cross-batch ----
    scores = lax.dot_general(q, k_pack, (((1,), (1,)), ((), ())),
                             preferred_element_type=jnp.float32)     # (BS, HBS)
    scores = scores + bbias_ref[...]                         # {0, -1e30} constant

    # softmax per (head, batch) group of S columns.  Stabilizer is the row max
    # over all packed groups: mathematically exact; a group sitting ~88 below
    # the row max would underflow to zero (impossible at this scale).
    # TODO(synk): switch to per-group maxima if reused at larger magnitudes.
    row_max = jnp.max(scores, axis=-1, keepdims=True)
    p = jnp.exp(scores - row_max)                            # masked cols -> 0
    denom = jnp.dot(p, gones_ref[...],
                    preferred_element_type=jnp.float32)      # per-group sums
    attn = p * pl.reciprocal(jnp.maximum(denom, 1e-30), approx=False)

    # heads land already concatenated along d_model (cols >= D_MODEL are zero)
    attn_out = jnp.dot(attn, v_pack, preferred_element_type=jnp.float32)  # (BS, 128)
    attn_out = jnp.dot(attn_out, wo_ref[...],
                       preferred_element_type=jnp.float32) + bo          # (BS, D)

    # ---- residual + LayerNorm 1 --------------------------------------------
    x1 = _layernorm(x + attn_out, g1, be1)

    # ---- Feed-forward: Linear -> ReLU -> Linear -----------------------------
    ff = jnp.dot(x1, w1_ref[...], preferred_element_type=jnp.float32) + b1
    ff = jnp.maximum(ff, 0.0)
    ff = jnp.dot(ff, w2_ref[...], preferred_element_type=jnp.float32) + b2

    # ---- residual + LayerNorm 2 --------------------------------------------
    o_ref[...] = _layernorm(x1 + ff, g2, be2).astype(o_ref.dtype)


def pack_params(params):
    """One-time packing of parameters + shape-only constants (hoisted out of
    the per-forward path)."""
    (wq, bq, wk, bk, wv, bv, wo, bo,
     g1, be1, w1, b1, w2, b2, g2, be2) = params

    def pad_lanes(m, width):
        return jnp.pad(m, ((0, 0), (0, width - m.shape[1])))

    # Fused QKV weight/bias, 1/sqrt(d_k) folded into Q, each of Q/K/V in its
    # own 128-lane tile.
    wqkv = jnp.concatenate([pad_lanes(wq * INV_SCALE, LANE),
                            pad_lanes(wk, LANE),
                            pad_lanes(wv, LANE)], axis=1)            # (D, 3*LANE)
    bqkv = jnp.concatenate([pad_lanes(bq * INV_SCALE, LANE),
                            pad_lanes(bk, LANE),
                            pad_lanes(bv, LANE)], axis=1)            # (1, 3*LANE)

    # W_o padded to 128 input rows (rows >= D_MODEL are zero; the matching
    # activation columns are zero too).
    wo_pad = jnp.pad(wo, ((0, LANE - D_MODEL), (0, 0)))              # (128, D)

    # All tiny (1, n) vectors packed into one slab -> fewer DMA descriptors.
    vec_slab = jnp.concatenate(
        [bqkv] + [pad_lanes(r, 3 * LANE)
                  for r in (bo, b1, b2, g1, be1, g2, be2)], axis=0)  # (8, 3*LANE)

    # ---- shape-only constants (built once on the host) ---------------------
    rows = np.arange(HBS)
    rmat = (rows[:, None] % BS == np.arange(BS)[None, :]).astype(np.float32)  # (HBS, BS)

    head_of_row = rows // BS
    col = np.arange(LANE)
    hmask_half = (head_of_row[:, None] == (col[None, :] // D_K)).astype(np.float32)
    hmask = np.concatenate([hmask_half, hmask_half], axis=1)         # (HBS, 2*LANE)

    grp = rows // S
    gones = (grp[:, None] == grp[None, :]).astype(np.float32)        # (HBS, HBS)

    q_batch = (np.arange(BS) // S)[:, None]
    k_batch = ((rows % BS) // S)[None, :]
    bbias = np.where(q_batch == k_batch, 0.0, -1e30).astype(np.float32)  # (BS, HBS)

    return (wqkv, wo_pad, w1, w2, vec_slab,
            jnp.asarray(rmat), jnp.asarray(hmask),
            jnp.asarray(gones), jnp.asarray(bbias))


@jax.jit
def transformer_block(x, packed):
    (wqkv, wo_pad, w1, w2, vec_slab, rmat, hmask, gones, bbias) = packed
    x2d = x.reshape(BS, D_MODEL)

    vmem = pl.BlockSpec(memory_space=pltpu.MemorySpace.VMEM)
    out2d = pl.pallas_call(
        transformer_block_kernel,
        out_shape=jax.ShapeDtypeStruct((BS, D_MODEL), x.dtype),
        in_specs=[vmem] * 10,
        out_specs=vmem,
    )(x2d, wqkv, wo_pad, w1, w2, vec_slab, rmat, hmask, gones, bbias)
    return out2d.reshape(B, S, D_MODEL)


def init_params(key):
    ks = jax.random.split(key, 8)
    std = 0.02
    # Linear weights stored pre-transposed: (in_features, out_features) so the
    # kernel can do x @ W directly (torch does x @ W.T with W (out, in)).
    wq = jax.random.normal(ks[0], (D_MODEL, D_MODEL), jnp.float32) * std
    wk = jax.random.normal(ks[1], (D_MODEL, D_MODEL), jnp.float32) * std
    wv = jax.random.normal(ks[2], (D_MODEL, D_MODEL), jnp.float32) * std
    wo = jax.random.normal(ks[3], (D_MODEL, D_MODEL), jnp.float32) * std
    w1 = jax.random.normal(ks[4], (D_MODEL, D_FF), jnp.float32) * std
    w2 = jax.random.normal(ks[5], (D_FF, D_MODEL), jnp.float32) * std
    bq = jax.random.normal(ks[6], (1, D_MODEL), jnp.float32) * std
    bk = jnp.zeros((1, D_MODEL), jnp.float32)
    bv = jax.random.normal(ks[7], (1, D_MODEL), jnp.float32) * std
    bo = jnp.zeros((1, D_MODEL), jnp.float32)
    b1 = jnp.zeros((1, D_FF), jnp.float32)
    b2 = jnp.zeros((1, D_MODEL), jnp.float32)
    g1 = jnp.ones((1, D_MODEL), jnp.float32)
    be1 = jnp.zeros((1, D_MODEL), jnp.float32)
    g2 = jnp.ones((1, D_MODEL), jnp.float32)
    be2 = jnp.zeros((1, D_MODEL), jnp.float32)
    return (wq, bq, wk, bk, wv, bv, wo, bo, g1, be1, w1, b1, w2, b2, g2, be2)


def reference(x, params):
    """Pure-JAX reference mirroring the PyTorch forward (dropout = identity)."""
    (wq, bq, wk, bk, wv, bv, wo, bo,
     g1, be1, w1, b1, w2, b2, g2, be2) = params
    q = x @ wq + bq
    k = x @ wk + bk
    v = x @ wv + bv

    def split(t):  # (B,S,D) -> (B,H,S,dk)
        return t.reshape(B, S, NUM_HEADS, D_K).transpose(0, 2, 1, 3)

    qh, kh, vh = split(q), split(k), split(v)
    scores = jnp.einsum("bhqd,bhkd->bhqk", qh, kh) / math.sqrt(D_K)
    attn = jax.nn.softmax(scores, axis=-1)
    out = jnp.einsum("bhqk,bhkd->bhqd", attn, vh)
    out = out.transpose(0, 2, 1, 3).reshape(B, S, D_MODEL)
    out = out @ wo + bo

    def ln(h, g, b):
        m = h.mean(-1, keepdims=True)
        va = ((h - m) ** 2).mean(-1, keepdims=True)
        return (h - m) / jnp.sqrt(va + EPS) * g + b

    x1 = ln(x + out, g1, be1)
    ff = jnp.maximum(x1 @ w1 + b1, 0.0) @ w2 + b2
    return ln(x1 + ff, g2, be2)


if __name__ == "__main__":
    key = jax.random.PRNGKey(0)
    kx, kp = jax.random.split(key)
    x = jax.random.normal(kx, (B, S, D_MODEL), jnp.float32)
    params = init_params(kp)

    packed = pack_params(params)            # one-time packing (hoisted)
    packed = jax.block_until_ready(packed)

    out = transformer_block(x, packed)
    out = jax.block_until_ready(out)

    ref = reference(x, params)
    np.testing.assert_allclose(np.asarray(out), np.asarray(ref), rtol=2e-5, atol=2e-5)

    print("KERNEL_OK")
</pallas_src>

<mosaic_0001>
module attributes {stable_mosaic.version = 11 : i64} {
  func.func @transformer_block_kernel(%arg0: memref<16x32xf32, #tpu.memory_space<vmem>>, %arg1: memref<32x384xf32, #tpu.memory_space<vmem>>, %arg2: memref<128x32xf32, #tpu.memory_space<vmem>>, %arg3: memref<32x64xf32, #tpu.memory_space<vmem>>, %arg4: memref<64x32xf32, #tpu.memory_space<vmem>>, %arg5: memref<8x384xf32, #tpu.memory_space<vmem>>, %arg6: memref<64x16xf32, #tpu.memory_space<vmem>>, %arg7: memref<64x256xf32, #tpu.memory_space<vmem>>, %arg8: memref<64x64xf32, #tpu.memory_space<vmem>>, %arg9: memref<16x64xf32, #tpu.memory_space<vmem>>, %arg10: memref<16x32xf32, #tpu.memory_space<vmem>>) attributes {dimension_semantics = [], scalar_prefetch = 0 : i64, scratch_operands = 0 : i64, tpu.core_type = #tpu.core_type<tc>} {
    %c0 = arith.constant 0 : index
    %c0_0 = arith.constant 0 : index
    %0 = vector.load %arg0[%c0, %c0_0] : memref<16x32xf32, #tpu.memory_space<vmem>>, vector<16x32xf32>
    %c0_1 = arith.constant 0 : index
    %c0_2 = arith.constant 0 : index
    %1 = vector.load %arg5[%c0_1, %c0_2] : memref<8x384xf32, #tpu.memory_space<vmem>>, vector<1x384xf32>
    %c1 = arith.constant 1 : index
    %c0_3 = arith.constant 0 : index
    %2 = vector.load %arg5[%c1, %c0_3] : memref<8x384xf32, #tpu.memory_space<vmem>>, vector<1x32xf32>
    %c2 = arith.constant 2 : index
    %c0_4 = arith.constant 0 : index
    %3 = vector.load %arg5[%c2, %c0_4] : memref<8x384xf32, #tpu.memory_space<vmem>>, vector<1x64xf32>
    %c3 = arith.constant 3 : index
    %c0_5 = arith.constant 0 : index
    %4 = vector.load %arg5[%c3, %c0_5] : memref<8x384xf32, #tpu.memory_space<vmem>>, vector<1x32xf32>
    %c4 = arith.constant 4 : index
    %c0_6 = arith.constant 0 : index
    %5 = vector.load %arg5[%c4, %c0_6] : memref<8x384xf32, #tpu.memory_space<vmem>>, vector<1x32xf32>
    %c5 = arith.constant 5 : index
    %c0_7 = arith.constant 0 : index
    %6 = vector.load %arg5[%c5, %c0_7] : memref<8x384xf32, #tpu.memory_space<vmem>>, vector<1x32xf32>
    %c6 = arith.constant 6 : index
    %c0_8 = arith.constant 0 : index
    %7 = vector.load %arg5[%c6, %c0_8] : memref<8x384xf32, #tpu.memory_space<vmem>>, vector<1x32xf32>
    %c7 = arith.constant 7 : index
    %c0_9 = arith.constant 0 : index
    %8 = vector.load %arg5[%c7, %c0_9] : memref<8x384xf32, #tpu.memory_space<vmem>>, vector<1x32xf32>
    %c0_10 = arith.constant 0 : index
    %c0_11 = arith.constant 0 : index
    %9 = vector.load %arg1[%c0_10, %c0_11] : memref<32x384xf32, #tpu.memory_space<vmem>>, vector<32x384xf32>
    %cst = arith.constant dense<0.000000e+00> : vector<16x384xf32>
    %10 = tpu.matmul %0, %9, %cst {dimension_numbers = #tpu.dot_dimension_numbers<[1], [0], [0], [1], [0, 0, 1, 1], [], []>} : vector<16x32xf32>, vector<32x384xf32>, vector<16x384xf32> -> vector<16x384xf32>
    %11 = vector.broadcast %1 : vector<1x384xf32> to vector<16x384xf32>
    %12 = arith.addf %10, %11 : vector<16x384xf32>
    %13 = vector.extract_strided_slice %12 {offsets = [0, 0], sizes = [16, 128], strides = [1, 1]} : vector<16x384xf32> to vector<16x128xf32>
    %14 = vector.extract_strided_slice %12 {offsets = [0, 128], sizes = [16, 256], strides = [1, 1]} : vector<16x384xf32> to vector<16x256xf32>
    %c0_12 = arith.constant 0 : index
    %c0_13 = arith.constant 0 : index
    %15 = vector.load %arg6[%c0_12, %c0_13] : memref<64x16xf32, #tpu.memory_space<vmem>>, vector<64x16xf32>
    %cst_14 = arith.constant dense<0.000000e+00> : vector<64x256xf32>
    %16 = tpu.matmul %15, %14, %cst_14 {dimension_numbers = #tpu.dot_dimension_numbers<[1], [0], [0], [1], [0, 0, 1, 1], [], []>} : vector<64x16xf32>, vector<16x256xf32>, vector<64x256xf32> -> vector<64x256xf32>
    %c0_15 = arith.constant 0 : index
    %c0_16 = arith.constant 0 : index
    %17 = vector.load %arg7[%c0_15, %c0_16] : memref<64x256xf32, #tpu.memory_space<vmem>>, vector<64x256xf32>
    %18 = arith.mulf %16, %17 : vector<64x256xf32>
    %19 = vector.extract_strided_slice %18 {offsets = [0, 0], sizes = [64, 128], strides = [1, 1]} : vector<64x256xf32> to vector<64x128xf32>
    %20 = vector.extract_strided_slice %18 {offsets = [0, 128], sizes = [64, 128], strides = [1, 1]} : vector<64x256xf32> to vector<64x128xf32>
    %cst_17 = arith.constant dense<0.000000e+00> : vector<16x64xf32>
    %21 = tpu.matmul %13, %19, %cst_17 {dimension_numbers = #tpu.dot_dimension_numbers<[1], [1], [0], [0], [0, 0, 1, 0], [], []>} : vector<16x128xf32>, vector<64x128xf32>, vector<16x64xf32> -> vector<16x64xf32>
    %c0_18 = arith.constant 0 : index
    %c0_19 = arith.constant 0 : index
    %22 = vector.load %arg9[%c0_18, %c0_19] : memref<16x64xf32, #tpu.memory_space<vmem>>, vector<16x64xf32>
    %23 = arith.addf %21, %22 : vector<16x64xf32>
    %cst_20 = arith.constant dense<0xFF800000> : vector<16xf32>
    %24 = vector.multi_reduction <maximumf>, %23, %cst_20 [1] : vector<16x64xf32> to vector<16xf32>
    %25 = vector.shape_cast %24 : vector<16xf32> to vector<16x1xf32>
    %26 = vector.broadcast %25 : vector<16x1xf32> to vector<16x64xf32>
    %27 = arith.subf %23, %26 : vector<16x64xf32>
    %28 = math.exp %27 : vector<16x64xf32>
    %c0_21 = arith.constant 0 : index
    %c0_22 = arith.constant 0 : index
    %29 = vector.load %arg8[%c0_21, %c0_22] : memref<64x64xf32, #tpu.memory_space<vmem>>, vector<64x64xf32>
    %cst_23 = arith.constant dense<0.000000e+00> : vector<16x64xf32>
    %30 = tpu.matmul %28, %29, %cst_23 {dimension_numbers = #tpu.dot_dimension_numbers<[1], [0], [0], [1], [0, 0, 1, 1], [], []>} : vector<16x64xf32>, vector<64x64xf32>, vector<16x64xf32> -> vector<16x64xf32>
    %cst_24 = arith.constant 1.000000e-30 : f32
    %31 = vector.broadcast %cst_24 : f32 to vector<16x64xf32>
    %32 = arith.maximumf %30, %31 : vector<16x64xf32>
    %33 = tpu.reciprocal %32 : vector<16x64xf32> -> vector<16x64xf32>
    %34 = arith.mulf %28, %33 : vector<16x64xf32>
    %cst_25 = arith.constant dense<0.000000e+00> : vector<16x128xf32>
    %35 = tpu.matmul %34, %20, %cst_25 {dimension_numbers = #tpu.dot_dimension_numbers<[1], [0], [0], [1], [0, 0, 1, 1], [], []>} : vector<16x64xf32>, vector<64x128xf32>, vector<16x128xf32> -> vector<16x128xf32>
    %c0_26 = arith.constant 0 : index
    %c0_27 = arith.constant 0 : index
    %36 = vector.load %arg2[%c0_26, %c0_27] : memref<128x32xf32, #tpu.memory_space<vmem>>, vector<128x32xf32>
    %cst_28 = arith.constant dense<0.000000e+00> : vector<16x32xf32>
    %37 = tpu.matmul %35, %36, %cst_28 {dimension_numbers = #tpu.dot_dimension_numbers<[1], [0], [0], [1], [0, 0, 1, 1], [], []>} : vector<16x128xf32>, vector<128x32xf32>, vector<16x32xf32> -> vector<16x32xf32>
    %38 = vector.broadcast %2 : vector<1x32xf32> to vector<16x32xf32>
    %39 = arith.addf %37, %38 : vector<16x32xf32>
    %40 = arith.addf %0, %39 : vector<16x32xf32>
    %cst_29 = arith.constant dense<0.000000e+00> : vector<16xf32>
    %41 = vector.multi_reduction <add>, %40, %cst_29 [1] : vector<16x32xf32> to vector<16xf32>
    %42 = vector.shape_cast %41 : vector<16xf32> to vector<16x1xf32>
    %cst_30 = arith.constant 3.200000e+01 : f32
    %43 = vector.broadcast %cst_30 : f32 to vector<16x1xf32>
    %44 = arith.divf %42, %43 : vector<16x1xf32>
    %45 = vector.broadcast %44 : vector<16x1xf32> to vector<16x32xf32>
    %46 = arith.subf %40, %45 : vector<16x32xf32>
    %47 = arith.mulf %46, %46 : vector<16x32xf32>
    %cst_31 = arith.constant dense<0.000000e+00> : vector<16xf32>
    %48 = vector.multi_reduction <add>, %47, %cst_31 [1] : vector<16x32xf32> to vector<16xf32>
    %49 = vector.shape_cast %48 : vector<16xf32> to vector<16x1xf32>
    %cst_32 = arith.constant 3.200000e+01 : f32
    %50 = vector.broadcast %cst_32 : f32 to vector<16x1xf32>
    %51 = arith.divf %49, %50 : vector<16x1xf32>
    %cst_33 = arith.constant 9.99999974E-6 : f32
    %52 = vector.broadcast %cst_33 : f32 to vector<16x1xf32>
    %53 = arith.addf %51, %52 : vector<16x1xf32>
    %54 = math.rsqrt %53 : vector<16x1xf32>
    %55 = vector.broadcast %54 : vector<16x1xf32> to vector<16x32xf32>
    %56 = arith.mulf %46, %55 : vector<16x32xf32>
    %57 = vector.broadcast %5 : vector<1x32xf32> to vector<16x32xf32>
    %58 = arith.mulf %56, %57 : vector<16x32xf32>
    %59 = vector.broadcast %6 : vector<1x32xf32> to vector<16x32xf32>
    %60 = arith.addf %58, %59 : vector<16x32xf32>
    %c0_34 = arith.constant 0 : index
    %c0_35 = arith.constant 0 : index
    %61 = vector.load %arg3[%c0_34, %c0_35] : memref<32x64xf32, #tpu.memory_space<vmem>>, vector<32x64xf32>
    %cst_36 = arith.constant dense<0.000000e+00> : vector<16x64xf32>
    %62 = tpu.matmul %60, %61, %cst_36 {dimension_numbers = #tpu.dot_dimension_numbers<[1], [0], [0], [1], [0, 0, 1, 1], [], []>} : vector<16x32xf32>, vector<32x64xf32>, vector<16x64xf32> -> vector<16x64xf32>
    %63 = vector.broadcast %3 : vector<1x64xf32> to vector<16x64xf32>
    %64 = arith.addf %62, %63 : vector<16x64xf32>
    %cst_37 = arith.constant 0.000000e+00 : f32
    %65 = vector.broadcast %cst_37 : f32 to vector<16x64xf32>
    %66 = arith.maximumf %64, %65 : vector<16x64xf32>
    %c0_38 = arith.constant 0 : index
    %c0_39 = arith.constant 0 : index
    %67 = vector.load %arg4[%c0_38, %c0_39] : memref<64x32xf32, #tpu.memory_space<vmem>>, vector<64x32xf32>
    %cst_40 = arith.constant dense<0.000000e+00> : vector<16x32xf32>
    %68 = tpu.matmul %66, %67, %cst_40 {dimension_numbers = #tpu.dot_dimension_numbers<[1], [0], [0], [1], [0, 0, 1, 1], [], []>} : vector<16x64xf32>, vector<64x32xf32>, vector<16x32xf32> -> vector<16x32xf32>
    %69 = vector.broadcast %4 : vector<1x32xf32> to vector<16x32xf32>
    %70 = arith.addf %68, %69 : vector<16x32xf32>
    %71 = arith.addf %60, %70 : vector<16x32xf32>
    %cst_41 = arith.constant dense<0.000000e+00> : vector<16xf32>
    %72 = vector.multi_reduction <add>, %71, %cst_41 [1] : vector<16x32xf32> to vector<16xf32>
    %73 = vector.shape_cast %72 : vector<16xf32> to vector<16x1xf32>
    %cst_42 = arith.constant 3.200000e+01 : f32
    %74 = vector.broadcast %cst_42 : f32 to vector<16x1xf32>
    %75 = arith.divf %73, %74 : vector<16x1xf32>
    %76 = vector.broadcast %75 : vector<16x1xf32> to vector<16x32xf32>
    %77 = arith.subf %71, %76 : vector<16x32xf32>
    %78 = arith.mulf %77, %77 : vector<16x32xf32>
    %cst_43 = arith.constant dense<0.000000e+00> : vector<16xf32>
    %79 = vector.multi_reduction <add>, %78, %cst_43 [1] : vector<16x32xf32> to vector<16xf32>
    %80 = vector.shape_cast %79 : vector<16xf32> to vector<16x1xf32>
    %cst_44 = arith.constant 3.200000e+01 : f32
    %81 = vector.broadcast %cst_44 : f32 to vector<16x1xf32>
    %82 = arith.divf %80, %81 : vector<16x1xf32>
    %cst_45 = arith.constant 9.99999974E-6 : f32
    %83 = vector.broadcast %cst_45 : f32 to vector<16x1xf32>
    %84 = arith.addf %82, %83 : vector<16x1xf32>
    %85 = math.rsqrt %84 : vector<16x1xf32>
    %86 = vector.broadcast %85 : vector<16x1xf32> to vector<16x32xf32>
    %87 = arith.mulf %77, %86 : vector<16x32xf32>
    %88 = vector.broadcast %7 : vector<1x32xf32> to vector<16x32xf32>
    %89 = arith.mulf %87, %88 : vector<16x32xf32>
    %90 = vector.broadcast %8 : vector<1x32xf32> to vector<16x32xf32>
    %91 = arith.addf %89, %90 : vector<16x32xf32>
    %c0_46 = arith.constant 0 : index
    %c0_47 = arith.constant 0 : index
    %92 = vector.load %arg10[%c0_46, %c0_47] : memref<16x32xf32, #tpu.memory_space<vmem>>, vector<16x32xf32>
    tpu.vector_store %arg10[%c0_46, %c0_47], %91 {strides = array<i32>} : memref<16x32xf32, #tpu.memory_space<vmem>>, vector<16x32xf32>,
    return
  }
}

</mosaic_0001>

<bundles_post_ra>
// kernel: transformer_block.1
= control target key start
LH: loop header
LB: loop body
LE: loop exit
PB: predicated region body
PF: predicated region fallthrough
CT: control target
= control target key end

     0   :  { %15 = vsyncpa [#allocation3], 0  ;;  %s1946_s0 = inlined_call_operand.hbm [shape: f32[16,32], index: 0, kind: input, shape index: {}]   ;;  %s1947_s1 = inlined_call_operand.vmem [shape: f32[32,384], index: 1, kind: input, shape index: {}]   ;;  %s1948_s2 = inlined_call_operand.vmem [shape: f32[128,32], index: 2, kind: input, shape index: {}]   ;;  %s1949_s3 = inlined_call_operand.hbm [shape: f32[32,64], index: 3, kind: input, shape index: {}]   ;;  %s1950_s4 = inlined_call_operand.vmem [shape: f32[64,32], index: 4, kind: input, shape index: {}]   ;;  %s1951_s5 = inlined_call_operand.vmem [shape: f32[8,384], index: 5, kind: input, shape index: {}]   ;;  %s1952_s6 = inlined_call_operand.vmem [shape: f32[64,16], index: 6, kind: input, shape index: {}]   ;;  %s1953_s7 = inlined_call_operand.vmem [shape: f32[64,256], index: 7, kind: input, shape index: {}]   ;;  %s1954_s8 = inlined_call_operand.vmem [shape: f32[64,64], index: 8, kind: input, shape index: {}]   ;;  %s1955_s9 = inlined_call_operand.hbm [shape: f32[16,64], index: 9, kind: input, shape index: {}]   ;;  %s1956_s10 = inlined_call_operand.hbm [shape: f32[16,32], index: 10, kind: output, shape index: {}]  }
   0x1   :  { %16 = vsyncpa [#allocation6], 0 }
   0x2   :  { %17 = vsyncpa [#allocation4], 0  ;;  %s1534_s13 = smov [#allocation5]   ;;  %s1535_s15 = smov [#allocation2]  }
   0x3   :  { %s39_s14 = sshll.u32 %s1534_s13, 4  ;;  %s23_s16 = sshll.u32 %s1535_s15, 4  ;;  %s40_s14 = int_to_ptr.vmem [resolvable:$true] %s39_s14  ;;  %s1596_s16 = int_to_ptr.vmem [resolvable:$true] %s23_s16 }
   0x4   :  { %s1440_s19 = scalar_lea.hbm %s1949_s3, 512 }
   0x5   :  { %p1441_p0 = scmp.ne.s32.totalorder %s1949_s3, %s1440_s19  ;;  %p1444_p1 = scmp.lt.u32.totalorder %s1440_s19, %s1949_s3 }
   0x7   :  { %p1446_p2 = pnand %p1444_p1, %p1441_p0 }
   0x9   :  { %1449 = shalt.err (!%p1446_p2)
}
   0xa   :  { %s1450_s24 = scalar_lea.vmem %s40_s14, 512  ;;  %p1455_p4 = scmp.lt.s32.totalorder %s40_s14, %s40_s14 }
   0xb   :  { %p1451_p3 = scmp.ne.s32.totalorder %s40_s14, %s1450_s24  ;;  %p1456_p5 = scmp.lt.s32.totalorder %s1450_s24, %s1450_s24 }
   0xd   :  { %p1457_p6 = por %p1456_p5, %p1455_p4 }
   0xf   :  { %p1458_p7 = pnand %p1457_p6, %p1451_p3 }
  0x11   :  { %1461 = shalt.err (!%p1458_p7)
}
  0x12   :  { %s1536_s25 = smov 128   ;;  %s1537_s26 = smov 8  }
  0x13   :  { %45 = dma.hbm_to_vmem [thread:$0]  %s1949_s3, 512, %s40_s14, [#allocation6], %s1536_s25, %s1536_s25, %s1537_s26  }
  0x14   :  { %s1462_s11 = scalar_lea.hbm %s1946_s0, 256 }
  0x15   :  { %p1463_p8 = scmp.ne.s32.totalorder %s1946_s0, %s1462_s11  ;;  %p1466_p9 = scmp.lt.u32.totalorder %s1462_s11, %s1946_s0 }
  0x17   :  { %p1468_p10 = pnand %p1466_p9, %p1463_p8 }
  0x19   :  { %1471 = shalt.err (!%p1468_p10)
}
  0x1a   :  { %s1472_s18 = scalar_lea.vmem %s1596_s16, 256  ;;  %p1477_p12 = scmp.lt.s32.totalorder %s1596_s16, %s1596_s16 }
  0x1b   :  { %p1473_p11 = scmp.ne.s32.totalorder %s1596_s16, %s1472_s18  ;;  %p1478_p13 = scmp.lt.s32.totalorder %s1472_s18, %s1472_s18 }
  0x1d   :  { %p1479_p0 = por %p1478_p13, %p1477_p12 }
  0x1f   :  { %p1480_p1 = pnand %p1479_p0, %p1473_p11 }
  0x21   :  { %1483 = shalt.err (!%p1480_p1)
}
  0x22   :  { %29 = dma.hbm_to_vmem [thread:$0]  %s1946_s0, 256, %s1596_s16, [#allocation3], %s1536_s25, %s1536_s25, %s1537_s26  }
  0x23   :  { %s1538_s19 = smov [#allocation7]   ;;  %s1484_s23 = scalar_lea.hbm %s1955_s9, 256 }
  0x24   :  { %s61_s20 = sshll.u32 %s1538_s19, 4  ;;  %p1485_p2 = scmp.ne.s32.totalorder %s1955_s9, %s1484_s23  ;;  %s62_s20 = int_to_ptr.vmem [resolvable:$true] %s61_s20 }
  0x25   :  { %p1488_p3 = scmp.lt.u32.totalorder %s1484_s23, %s1955_s9 }
  0x27   :  { %p1490_p4 = pnand %p1488_p3, %p1485_p2 }
  0x29   :  { %1493 = shalt.err (!%p1490_p4)
}
  0x2a   :  { %s1494_s30 = scalar_lea.vmem %s62_s20, 256  ;;  %p1499_p6 = scmp.lt.s32.totalorder %s62_s20, %s62_s20 }
  0x2b   :  { %p1495_p5 = scmp.ne.s32.totalorder %s62_s20, %s1494_s30  ;;  %p1500_p7 = scmp.lt.s32.totalorder %s1494_s30, %s1494_s30 }
  0x2d   :  { %p1501_p8 = por %p1500_p7, %p1499_p6 }
  0x2f   :  { %p1502_p9 = pnand %p1501_p8, %p1495_p5 }
  0x31   :  { %1505 = shalt.err (!%p1502_p9)
}
  0x32   :  { %67 = dma.hbm_to_vmem [thread:$0]  %s1955_s9, 256, %s62_s20, [#allocation6], %s1536_s25, %s1536_s25, %s1537_s26  }
  0x33   :  { %1528 = dma.done.wait [#allocation3], 256  }
  0x34   :  { %1529 = vsyncadd [#allocation3], 4294967040 }
  0x35   :  { %1530 = dma.done.wait [#allocation6], 768  }
  0x36   :  { %1531 = vsyncadd [#allocation6], 4294966528  ;;  %v1539_v0 = vmov 0.0   ;;  %v88_v1 = vld [vmem:[%s1947_s1 + $0x8] sm:$0xff]  ;;  %v91_v2 = vld [vmem:[%s1947_s1 + $0x20] sm:$0xff]  ;;  %vm115_vm0 = vcmask 261120   ;;  %v100_v21 = vlaneseq }
  0x37   :  { %186 = vmatprep.mubr.f32.mxu0 %v1539_v0  ;;  %v87_v3 = vld [vmem:[%s1947_s1] sm:$0xff]  ;;  %v1293_v4 = vpack.c.bf16 %v91_v2, %v88_v1  ;;  %v90_v5 = vld [vmem:[%s1947_s1 + $0x18] sm:$0xff]  ;;  %v89_v6 = vld [vmem:[%s1947_s1 + $0x10] sm:$0xff]  ;;  %vm282_vm1 = vcmask 130048   ;;  %vm529_vm2 = vcmask 523264  }
  0x38   :  { %v92_v7 = vld [vmem:[%s1947_s1 + $0x28] sm:$0xff]  ;;  %v1295_v8 = vpack.c.bf16 %v90_v5, %v87_v3  ;;  %v94_v10 = vld [vmem:[%s1947_s1 + $0x38] sm:$0xff]  ;;  %v97_v11 = vld [vmem:[%s1947_s1 + $0x50] sm:$0xff]  ;;  %v101_v22 = vshrl.u32 %v100_v21, 7 }
  0x39   :  { %v1301_v9 = vpack.c.bf16 %v92_v7, %v89_v6  ;;  %v93_v12 = vld [vmem:[%s1947_s1 + $0x30] sm:$0xff]  ;;  %1294 = vmatprep.subr.bf16.mxu0 %v1293_v4  ;;  %v1297_v13 = vpack.c.bf16 %v97_v11, %v94_v10  ;;  %v96_v14 = vld [vmem:[%s1947_s1 + $0x48] sm:$0xff]  ;;  %v95_v15 = vld [vmem:[%s1947_s1 + $0x40] sm:$0xff] }
  0x3a   :  { %v98_v16 = vld [vmem:[%s1947_s1 + $0x58] sm:$0xff]  ;;  %1296 = vmatpush1.bf16.msra.mxu0 %v1295_v8  ;;  %v1299_v17 = vpack.c.bf16 %v96_v14, %v93_v12  ;;  %v1685_v19 = vld [vmem:[#allocation2] sm:$0xff]  ;;  %v1689_v20 = vld [vmem:[#allocation2 + $0x8] sm:$0xff]  ;;  %v102_v23 = vsub.s32 0, %v101_v22  ;;  %v110_v25 = vsub.s32 2, %v101_v22  ;;  %v106_v27 = vsub.s32 1, %v101_v22 }
  0x3b   :  { %1302 = vmatprep.subr.bf16.mxu1 %v1301_v9  ;;  %v1305_v18 = vpack.c.bf16 %v98_v16, %v95_v15  ;;  %1298 = vmatprep.subr.bf16.mxu0 %v1297_v13  ;;  %v79_v24 = vld [vmem:[%s1951_s5] ss:$8 sm:$0x7]  ;;  %v277_v47 = vld [vmem:[%s1952_s6 + $0x18] sm:$0xff] }
  0x3c   :  { %1304 = vmatpush3.bf16.msra.mxu1 %v1301_v9  ;;  %1168 = vmatprep.mubr.msk.f32.mxu1 %vm115_vm0, %v1685_v19  ;;  %v103_v26 = vrot.slane %v79_v24, %v102_v23  ;;  %v111_v28 = vrot.slane %v79_v24, %v110_v25  ;;  %v107_v33 = vrot.slane %v79_v24, %v106_v27  ;;  %v274_v44 = vld [vmem:[%s1952_s6] sm:$0xff]  ;;  %v275_v45 = vld [vmem:[%s1952_s6 + $0x8] sm:$0xff]  ;;  %v276_v46 = vld [vmem:[%s1952_s6 + $0x10] sm:$0xff] }
  0x3d   :  { %1306 = vmatprep.subr.bf16.mxu1 %v1305_v18  ;;  %v278_v48 = vld [vmem:[%s1952_s6 + $0x20] sm:$0xff]  ;;  %v279_v49 = vld [vmem:[%s1952_s6 + $0x28] sm:$0xff]  ;;  %v280_v50 = vld [vmem:[%s1952_s6 + $0x30] sm:$0xff] }
  0x3e   :  { %1300 = vmatpush1.bf16.msra.mxu0 %v1299_v17  ;;  %v281_v51 = vld [vmem:[%s1952_s6 + $0x38] sm:$0xff]  ;;  %v420_v54 = vld [vmem:[%s1953_s7] sm:$0xff]  ;;  %v422_v55 = vld [vmem:[%s1953_s7 + $0x10] sm:$0xff] }
  0x3f   :  { %v421_v56 = vld [vmem:[%s1953_s7 + $0x8] sm:$0xff]  ;;  %v423_v57 = vld [vmem:[%s1953_s7 + $0x18] sm:$0xff]  ;;  %v424_v4 = vld [vmem:[%s1953_s7 + $0x20] sm:$0xff] }
  0x40   :  { %1308 = vmatpush3.bf16.msra.mxu1 %v1305_v18  ;;  %v426_v5 = vld [vmem:[%s1953_s7 + $0x30] sm:$0xff]  ;;  %v425_v6 = vld [vmem:[%s1953_s7 + $0x28] sm:$0xff]  ;;  %v427_v7 = vld [vmem:[%s1953_s7 + $0x38] sm:$0xff] }
  0x41   :  { %1070 = vmatmul.mubr.msk.f32.vlgmr.msra.gmra.mrb[0].mxu0 %vm115_vm0, %v1685_v19  ;;  %v428_v18 = vld [vmem:[%s1953_s7 + $0x40] sm:$0xff]  ;;  %v430_v21 = vld [vmem:[%s1953_s7 + $0x50] sm:$0xff]  ;;  %v429_v22 = vld [vmem:[%s1953_s7 + $0x48] sm:$0xff] }
  0x42   :  { %192 = vmatprep.mubr.f32.mxu0 %v1539_v0  ;;  %v431_v23 = vld [vmem:[%s1953_s7 + $0x58] sm:$0xff] }
  0x43   :  { %1169 = vmatmul.mubr.msk.f32.vlgmr.msra.gmra.mrb[0].mxu1 %vm115_vm0, %v1689_v20 }
  0x44   :  { %371 = vmatprep.mubr.f32.mxu1 %v1539_v0 }
  0x45   :  { %1071 = vmatmul.mubr.msk.f32.gmra.mrb[2].mxu0 %vm115_vm0, %v1689_v20 }
 0x114   :  { %v188_v29 = vpop.f32.mrb[0].mxu0 }
 0x115   :  { %v189_v30 = vadd.f32 %v188_v29, %v103_v26  ;;  %v190_v31 = vpop.f32.mrb[1].mxu0 }
 0x116   :  { %v1170_v32 = vpop.f32.mrb[0].mxu1  ;;  %v191_v41 = vadd.f32 %v190_v31, %v107_v33 }
 0x117   :  { %v271_v34 = vadd.f32 %v1170_v32, %v111_v28  ;;  %v265_v35 = vpop.f32.mrb[1].mxu1  ;;  %1187 = vmatprep.mubr.f32.mxu0 %v189_v30 }
 0x118   :  { %v266_v36 = vadd.f32 %v265_v35, %v111_v28  ;;  %v194_v37 = vpop.f32.mrb[2].mxu0  ;;  %v434_v35 = vld [vmem:[%s1953_s7 + $0x70] sm:$0xff] }
 0x119   :  { %v1702_v39 = vadd.f32 %v194_v37, %v103_v26  ;;  %v196_v40 = vpop.f32.mrb[3].mxu0  ;;  %v435_v37 = vld [vmem:[%s1953_s7 + $0x78] sm:$0xff] }
 0x11a   :  { %v1309_v38 = vpack.c.bf16 %v271_v34, %v266_v36  ;;  %v197_v42 = vadd.f32 %v196_v40, %v107_v33  ;;  %v432_v34 = vld [vmem:[%s1953_s7 + $0x60] sm:$0xff]  ;;  %v433_v36 = vld [vmem:[%s1953_s7 + $0x68] sm:$0xff]  ;;  %s1540_s7 = smov [#allocation8]  }
 0x11b   :  { %s1057_s9 = sshll.u32 %s1540_s7, 4  ;;  %s1058_s9 = int_to_ptr.vmem [resolvable:$true] %s1057_s9 }
 0x11c   :  { %1310 = vmatprep.subr.bf16.mxu1 %v1309_v38  ;;  %v1311_v43 = vpack.c.bf16 %v197_v42, %v191_v41  ;;  %s1506_s3 = scalar_lea.vmem %s1058_s9, 256  ;;  %p1511_p11 = scmp.lt.s32.totalorder %s1058_s9, %s1058_s9 }
 0x11d   :  { %p1507_p10 = scmp.ne.s32.totalorder %s1058_s9, %s1506_s3  ;;  %p1512_p12 = scmp.lt.s32.totalorder %s1506_s3, %s1506_s3 }
 0x11e   :  { %1312 = vmatpush1.bf16.msra.mxu1 %v1311_v43 }
 0x11f   :  { %p1513_p13 = por %p1512_p12, %p1511_p11 }
 0x121   :  { %1074 = vmatmul.mubr.msk.f32.vlgmr.msra.gmra.mrb[2].mxu1 %vm282_vm1, %v274_v44  ;;  %p1514_p0 = pnand %p1513_p13, %p1507_p10 }
 0x122   :  { %377 = vmatprep.mubr.f32.mxu1 %v1539_v0 }
 0x125   :  { %1075 = vmatmul.mubr.msk.f32.gmra.mrb[4].mxu1 %vm282_vm1, %v275_v45 }
 0x126   :  { %383 = vmatprep.mubr.f32.mxu1 %v1539_v0 }
 0x129   :  { %1076 = vmatmul.mubr.msk.f32.gmra.mrb[6].mxu1 %vm282_vm1, %v276_v46 }
 0x12a   :  { %389 = vmatprep.mubr.f32.mxu1 %v1539_v0 }
 0x12d   :  { %1077 = vmatmul.mubr.msk.f32.gmra.mrb[8].mxu1 %vm282_vm1, %v277_v47  ;;  %v542_v47 = vld [vmem:[%s1954_s8] sm:$0xff] }
 0x12e   :  { %395 = vmatprep.mubr.f32.mxu1 %v1539_v0 }
 0x131   :  { %1078 = vmatmul.mubr.msk.f32.gmra.mrb[10].mxu1 %vm282_vm1, %v278_v48  ;;  %v543_v48 = vld [vmem:[%s1954_s8 + $0x8] sm:$0xff] }
 0x132   :  { %401 = vmatprep.mubr.f32.mxu1 %v1539_v0 }
 0x135   :  { %1079 = vmatmul.mubr.msk.f32.gmra.mrb[12].mxu1 %vm282_vm1, %v279_v49  ;;  %v544_v49 = vld [vmem:[%s1954_s8 + $0x10] sm:$0xff] }
 0x136   :  { %407 = vmatprep.mubr.f32.mxu1 %v1539_v0 }
 0x139   :  { %1080 = vmatmul.mubr.msk.f32.gmra.mrb[14].mxu1 %vm282_vm1, %v280_v50  ;;  %v545_v50 = vld [vmem:[%s1954_s8 + $0x18] sm:$0xff] }
 0x13a   :  { %413 = vmatprep.mubr.f32.mxu1 %v1539_v0 }
 0x13d   :  { %1081 = vmatmul.mubr.msk.f32.gmra.mrb[16].mxu1 %vm282_vm1, %v281_v51  ;;  %v1333_v51 = vpack.c.bf16 %v545_v50, %v544_v49 }
 0x1f4   :  { %v373_v52 = vpop.f32.mrb[2].mxu1 }
 0x1f5   :  { %v375_v53 = vpop.f32.mrb[3].mxu1  ;;  %v436_v59 = vmul.f32 %v420_v54, %v373_v52  ;;  %v452_v52 = vld [vmem:[#allocation7] sm:$0xff]  ;;  %v453_v54 = vld [vmem:[#allocation7 + $0x8] sm:$0xff] }
 0x1f6   :  { %v437_v62 = vmul.f32 %v421_v56, %v375_v53 }
 0x1f8   :  { %v379_v58 = vpop.f32.mrb[4].mxu1 }
 0x1f9   :  { %v438_v60 = vmul.f32 %v422_v55, %v379_v58  ;;  %v381_v61 = vpop.f32.mrb[5].mxu1 }
 0x1fa   :  { %v439_v63 = vmul.f32 %v423_v57, %v381_v61  ;;  %v547_v61 = vld [vmem:[%s1954_s8 + $0x28] sm:$0xff] }
 0x1fb   :  { %v1313_v0 = vpack.c.bf16 %v438_v60, %v436_v59  ;;  %v546_v60 = vld [vmem:[%s1954_s8 + $0x20] sm:$0xff] }
 0x1fc   :  { %v1345_v1 = vpack.c.bf16 %v439_v63, %v437_v62  ;;  %v385_v2 = vpop.f32.mrb[6].mxu1  ;;  %v1337_v62 = vpack.c.bf16 %v547_v61, %v546_v60  ;;  %v548_v63 = vld [vmem:[%s1954_s8 + $0x30] sm:$0xff] }
 0x1fd   :  { %v387_v3 = vpop.f32.mrb[7].mxu1  ;;  %1314 = vmatprep.subr.bf16.mxu0 %v1313_v0  ;;  %v440_v9 = vmul.f32 %v424_v4, %v385_v2 }
 0x1fe   :  { %1316 = vmatpush3.bf16.xpose.msra.mxu0 %v1313_v0  ;;  %v441_v12 = vmul.f32 %v425_v6, %v387_v3  ;;  %v549_v0 = vld [vmem:[%s1954_s8 + $0x38] sm:$0xff] }
 0x200   :  { %v391_v8 = vpop.f32.mrb[8].mxu1 }
 0x201   :  { %v442_v10 = vmul.f32 %v426_v5, %v391_v8  ;;  %v393_v11 = vpop.f32.mrb[9].mxu1 }
 0x202   :  { %v443_v13 = vmul.f32 %v427_v7, %v393_v11  ;;  %v719_v11 = vld [vmem:[%s1948_s2 + $0x8] sm:$0xff] }
 0x203   :  { %v1317_v14 = vpack.c.bf16 %v442_v10, %v440_v9  ;;  %v718_v10 = vld [vmem:[%s1948_s2] sm:$0xff] }
 0x204   :  { %v1349_v15 = vpack.c.bf16 %v443_v13, %v441_v12  ;;  %v397_v16 = vpop.f32.mrb[10].mxu1  ;;  %v720_v12 = vld [vmem:[%s1948_s2 + $0x10] sm:$0xff]  ;;  %v1361_v13 = vpack.c.bf16 %v719_v11, %v718_v10 }
 0x205   :  { %v399_v17 = vpop.f32.mrb[11].mxu1  ;;  %1318 = vmatprep.subr.bf16.mxu0 %v1317_v14  ;;  %v444_v25 = vmul.f32 %v428_v18, %v397_v16  ;;  %v722_v16 = vld [vmem:[%s1948_s2 + $0x20] sm:$0xff] }
 0x206   :  { %1320 = vmatpush3.bf16.xpose.msra.mxu0 %v1317_v14  ;;  %v445_v28 = vmul.f32 %v429_v22, %v399_v17  ;;  %v721_v14 = vld [vmem:[%s1948_s2 + $0x18] sm:$0xff]  ;;  %v723_v17 = vld [vmem:[%s1948_s2 + $0x28] sm:$0xff] }
 0x207   :  { %v1369_v18 = vpack.c.bf16 %v723_v17, %v722_v16  ;;  %v725_v22 = vld [vmem:[%s1948_s2 + $0x38] sm:$0xff]  ;;  %v84_v17 = vld [vmem:[%s1951_s5 + $0x5] ss:$0 sm:$0xff] }
 0x208   :  { %v403_v24 = vpop.f32.mrb[12].mxu1 }
 0x209   :  { %v446_v26 = vmul.f32 %v430_v21, %v403_v24  ;;  %v405_v27 = vpop.f32.mrb[13].mxu1  ;;  %v724_v21 = vld [vmem:[%s1948_s2 + $0x30] sm:$0xff]  ;;  %v726_v24 = vld [vmem:[%s1948_s2 + $0x40] sm:$0xff] }
 0x20a   :  { %v447_v29 = vmul.f32 %v431_v23, %v405_v27  ;;  %v1373_v23 = vpack.c.bf16 %v725_v22, %v724_v21  ;;  %v728_v27 = vld [vmem:[%s1948_s2 + $0x50] sm:$0xff] }
 0x20b   :  { %v1321_v30 = vpack.c.bf16 %v446_v26, %v444_v25  ;;  %v727_v25 = vld [vmem:[%s1948_s2 + $0x48] sm:$0xff] }
 0x20c   :  { %v1353_v31 = vpack.c.bf16 %v447_v29, %v445_v28  ;;  %v409_v32 = vpop.f32.mrb[14].mxu1  ;;  %v1377_v26 = vpack.c.bf16 %v727_v25, %v726_v24  ;;  %v729_v28 = vld [vmem:[%s1948_s2 + $0x58] sm:$0xff]  ;;  %v931_v24 = vld [vmem:[%s1950_s4 + $0x10] sm:$0xff] }
 0x20d   :  { %v411_v33 = vpop.f32.mrb[15].mxu1  ;;  %1322 = vmatprep.subr.bf16.mxu0 %v1321_v30  ;;  %v448_v40 = vmul.f32 %v432_v34, %v409_v32  ;;  %v1381_v29 = vpack.c.bf16 %v729_v28, %v728_v27  ;;  %v733_v34 = vld [vmem:[%s1948_s2 + $0x78] sm:$0xff] }
 0x20e   :  { %1324 = vmatpush3.bf16.xpose.msra.mxu0 %v1321_v30  ;;  %v449_v43 = vmul.f32 %v433_v36, %v411_v33  ;;  %v730_v30 = vld [vmem:[%s1948_s2 + $0x60] sm:$0xff]  ;;  %v732_v33 = vld [vmem:[%s1948_s2 + $0x70] sm:$0xff]  ;;  %v932_v25 = vld [vmem:[%s1950_s4 + $0x18] sm:$0xff] }
 0x20f   :  { %v1405_v28 = vpack.c.bf16 %v932_v25, %v931_v24 }
 0x210   :  { %v415_v38 = vpop.f32.mrb[16].mxu1 }
 0x211   :  { %v450_v41 = vmul.f32 %v434_v35, %v415_v38  ;;  %v417_v42 = vpop.f32.mrb[17].mxu1  ;;  %v1389_v35 = vpack.c.bf16 %v733_v34, %v732_v33  ;;  %v936_v33 = vld [vmem:[%s1950_s4 + $0x38] sm:$0xff] }
 0x212   :  { %v451_v44 = vmul.f32 %v435_v37, %v417_v42 }
 0x213   :  { %v1325_v45 = vpack.c.bf16 %v450_v41, %v448_v40 }
 0x214   :  { %v1357_v46 = vpack.c.bf16 %v451_v44, %v449_v43 }
 0x215   :  { %1326 = vmatprep.subr.bf16.mxu0 %v1325_v45 }
 0x216   :  { %1328 = vmatpush3.bf16.xpose.msra.mxu0 %v1325_v45 }
 0x217   :  { %1346 = vmatprep.subr.bf16.mxu0 %v1345_v1 }
 0x21d   :  { %1188 = vmatmul.mubr.f32.vlgmr.msra.gmra.mrb[4].mxu0 %v1702_v39  ;;  %v1329_v39 = vpack.c.bf16 %v543_v48, %v542_v47  ;;  %v80_v47 = vld [vmem:[%s1951_s5 + $0x1] ss:$0 sm:$0xff] }
 0x21e   :  { %1348 = vmatpush3.bf16.msra.mxu0 %v1345_v1  ;;  %v1341_v1 = vpack.c.bf16 %v549_v0, %v548_v63  ;;  %v842_v0 = vld [vmem:[#allocation5] sm:$0xff] }
 0x21f   :  { %1350 = vmatprep.subr.bf16.mxu0 %v1349_v15  ;;  %1330 = vmatprep.subr.bf16.mxu1 %v1329_v39 }
 0x220   :  { %1332 = vmatpush3.bf16.msra.mxu1 %v1329_v39 }
 0x221   :  { %1334 = vmatprep.subr.bf16.mxu1 %v1333_v51 }
 0x222   :  { %1352 = vmatpush3.bf16.msra.mxu0 %v1349_v15  ;;  %v1365_v15 = vpack.c.bf16 %v721_v14, %v720_v12 }
 0x223   :  { %1354 = vmatprep.subr.bf16.mxu0 %v1353_v31 }
 0x224   :  { %1336 = vmatpush3.bf16.msra.mxu1 %v1333_v51 }
 0x225   :  { %1338 = vmatprep.subr.bf16.mxu1 %v1337_v62 }
 0x226   :  { %1356 = vmatpush3.bf16.msra.mxu0 %v1353_v31  ;;  %v731_v31 = vld [vmem:[%s1948_s2 + $0x68] sm:$0xff] }
 0x227   :  { %1358 = vmatprep.subr.bf16.mxu0 %v1357_v46  ;;  %v1385_v32 = vpack.c.bf16 %v731_v31, %v730_v30  ;;  %v934_v30 = vld [vmem:[%s1950_s4 + $0x28] sm:$0xff] }
 0x228   :  { %1340 = vmatpush3.bf16.msra.mxu1 %v1337_v62 }
 0x229   :  { %1342 = vmatprep.subr.bf16.mxu1 %v1341_v1 }
 0x22a   :  { %1360 = vmatpush3.bf16.msra.mxu0 %v1357_v46 }
 0x22c   :  { %1344 = vmatpush3.bf16.msra.mxu1 %v1341_v1 }
 0x22d   :  { %1362 = vmatprep.subr.bf16.mxu1 %v1361_v13 }
 0x2f0   :  { %v1189_v53 = vpop.f32.mrb[4].mxu0 }
 0x2f1   :  { %v520_v55 = vpop.f32.mrb[5].mxu0  ;;  %v526_v57 = vadd.f32 %v1189_v53, %v453_v54 }
 0x2f2   :  { %v521_v56 = vadd.f32 %v520_v55, %v452_v52 }
 0x2f3   :  { %v533_v59 = vsel %vm529_vm2, %v526_v57, -inf }
 0x2f4   :  { %v530_v58 = vsel %vm529_vm2, %v521_v56, -inf }
 0x2f5   :  { %531 = vmax.xlane.f32.xlu0 %v530_v58 }
 0x2f9   :  { %534 = vmax.xlane.f32.xlu0 %v533_v59 }
 0x382   :  { %v532_v2 = vpop.xlane.xlu0 %531 }
 0x383   :  { %v536_v3 = vsub.f32 %v521_v56, %v532_v2  ;;  %v844_v2 = vld [vmem:[#allocation5 + $0x10] sm:$0xff] }
 0x385   :  { %v538_v4 = vmul.f32 1.442695, %v536_v3  ;;  %v845_v3 = vld [vmem:[#allocation5 + $0x18] sm:$0xff] }
 0x386   :  { %v535_v5 = vpop.xlane.xlu0 %534 }
 0x387   :  { %1424 = vpow2.f32 %v538_v4  ;;  %v537_v6 = vsub.f32 %v526_v57, %v535_v5  ;;  %v1397_v4 = vpack.c.bf16 %v845_v3, %v844_v2  ;;  %v929_v5 = vld [vmem:[%s1950_s4] sm:$0xff] }
 0x388   :  { %v85_v2 = vld [vmem:[%s1951_s5 + $0x6] ss:$0 sm:$0xff] }
 0x389   :  { %v540_v7 = vmul.f32 1.442695, %v537_v6  ;;  %v930_v6 = vld [vmem:[%s1950_s4 + $0x8] sm:$0xff] }
 0x38b   :  { %1426 = vpow2.f32 %v540_v7  ;;  %v1401_v7 = vpack.c.bf16 %v930_v6, %v929_v5  ;;  %v86_v6 = vld [vmem:[%s1951_s5 + $0x7] ss:$0 sm:$0xff] }
 0x391   :  { %v1425_v8 = vpop.eup %1424 }
 0x392   :  { %1206 = vmatprep.mubr.msk.f32.mxu1 %vm529_vm2, %v1425_v8 }
 0x395   :  { %v1427_v9 = vpop.eup %1426 }
 0x396   :  { %1207 = vmatmul.mubr.msk.f32.vlgmr.msra.gmra.mrb[18].mxu1 %vm529_vm2, %v1427_v9 }
 0x397   :  { %1364 = vmatpush3.bf16.msra.mxu1 %v1361_v13 }
 0x398   :  { %1366 = vmatprep.subr.bf16.mxu1 %v1365_v15 }
 0x39b   :  { %1368 = vmatpush3.bf16.msra.mxu1 %v1365_v15  ;;  %v83_v15 = vld [vmem:[%s1951_s5 + $0x4] ss:$0 sm:$0xff] }
 0x39c   :  { %1370 = vmatprep.subr.bf16.mxu1 %v1369_v18 }
 0x39f   :  { %1372 = vmatpush3.bf16.msra.mxu1 %v1369_v18 }
 0x3a0   :  { %1374 = vmatprep.subr.bf16.mxu1 %v1373_v23 }
 0x3a3   :  { %1376 = vmatpush3.bf16.msra.mxu1 %v1373_v23 }
 0x3a4   :  { %1378 = vmatprep.subr.bf16.mxu1 %v1377_v26 }
 0x3a7   :  { %1380 = vmatpush3.bf16.msra.mxu1 %v1377_v26 }
 0x3a8   :  { %1382 = vmatprep.subr.bf16.mxu1 %v1381_v29 }
 0x3ab   :  { %1384 = vmatpush3.bf16.msra.mxu1 %v1381_v29  ;;  %v933_v29 = vld [vmem:[%s1950_s4 + $0x20] sm:$0xff] }
 0x3ac   :  { %1386 = vmatprep.subr.bf16.mxu1 %v1385_v32  ;;  %v1409_v31 = vpack.c.bf16 %v934_v30, %v933_v29 }
 0x3af   :  { %1388 = vmatpush3.bf16.msra.mxu1 %v1385_v32  ;;  %v935_v32 = vld [vmem:[%s1950_s4 + $0x30] sm:$0xff] }
 0x3b0   :  { %1390 = vmatprep.subr.bf16.mxu1 %v1389_v35  ;;  %v1413_v34 = vpack.c.bf16 %v936_v33, %v935_v32 }
 0x3b3   :  { %1392 = vmatpush3.bf16.msra.mxu1 %v1389_v35  ;;  %v81_v35 = vld [vmem:[%s1951_s5 + $0x2] ss:$0 sm:$0xff] }
 0x469   :  { %v1208_v36 = vpop.f32.mrb[18].mxu1 }
 0x46a   :  { %v632_v37 = vmax.f32 %v1208_v36, 1e-30  ;;  %v622_v38 = vpop.f32.mrb[19].mxu1 }
 0x46b   :  { %v631_v40 = vmax.f32 %v622_v38, 1e-30 }
 0x46c   :  { %1428 = vrcp.f32 %v632_v37 }
 0x46d   :  { %1430 = vrcp.f32 %v631_v40 }
 0x476   :  { %v1429_v41 = vpop.eup %1428 }
 0x477   :  { %v1431_v42 = vpop.eup %1430  ;;  %v636_v44 = vmul.f32 %v1429_v41, %v1427_v9 }
 0x478   :  { %v635_v43 = vmul.f32 %v1431_v42, %v1425_v8 }
 0x47a   :  { %1225 = vmatprep.mubr.msk.f32.mxu0 %vm529_vm2, %v635_v43  ;;  %v82_v43 = vld [vmem:[%s1951_s5 + $0x3] ss:$0 sm:$0xff] }
 0x47b   :  { %1226 = vmatmul.mubr.msk.f32.vlgmr.msra.gmra.mrb[6].mxu0 %vm529_vm2, %v636_v44 }
 0x54e   :  { %v1227_v45 = vpop.f32.mrb[6].mxu0 }
 0x54f   :  { %v709_v46 = vpop.f32.mrb[7].mxu0 }
 0x550   :  { %1260 = vmatprep.mubr.f32.mxu1 %v709_v46 }
 0x551   :  { %1261 = vmatmul.mubr.f32.vlgmr.msra.gmra.mrb[20].mxu1 %v1227_v45 }
 0x624   :  { %v1262_v48 = vpop.f32.mrb[20].mxu1 }
 0x625   :  { %v800_v49 = vpop.f32.mrb[21].mxu1  ;;  %v806_v39 = vadd.f32 %v1262_v48, %v80_v47 }
 0x626   :  { %v801_v50 = vadd.f32 %v800_v49, %v80_v47 }
 0x627   :  { %v810_v53 = vadd.f32 %v806_v39, %v1689_v20  ;;  %v843_v20 = vld [vmem:[#allocation5 + $0x8] sm:$0xff] }
 0x628   :  { %v809_v51 = vadd.f32 %v801_v50, %v1685_v19  ;;  %v1393_v1 = vpack.c.bf16 %v843_v20, %v842_v0 }
 0x629   :  { %v814_v54 = vsel %vm115_vm0, %v810_v53, 0.0 }
 0x62a   :  { %v811_v52 = vsel %vm115_vm0, %v809_v51, 0.0  ;;  %1394 = vmatprep.subr.bf16.mxu0 %v1393_v1 }
 0x62b   :  { %812 = vadd.xlane.f32.xlu1 %v811_v52  ;;  %1396 = vmatpush3.bf16.msra.mxu0 %v1393_v1 }
 0x62c   :  { %1398 = vmatprep.subr.bf16.mxu0 %v1397_v4 }
 0x62f   :  { %815 = vadd.xlane.f32.xlu1 %v814_v54  ;;  %1400 = vmatpush3.bf16.msra.mxu0 %v1397_v4 }
 0x630   :  { %1402 = vmatprep.subr.bf16.mxu0 %v1401_v7 }
 0x6b8   :  { %v813_v55 = vpop.xlane.xlu1 %812 }
 0x6b9   :  { %v818_v56 = vmul.f32 0.03125, %v813_v55 }
 0x6bb   :  { %v820_v57 = vsub.f32 %v809_v51, %v818_v56 }
 0x6bc   :  { %v816_v58 = vpop.xlane.xlu1 %815 }
 0x6bd   :  { %v819_v59 = vmul.f32 0.03125, %v816_v58  ;;  %v822_v60 = vmul.f32 %v820_v57, %v820_v57 }
 0x6bf   :  { %v821_v61 = vsub.f32 %v810_v53, %v819_v59  ;;  %v824_v62 = vsel %vm115_vm0, %v822_v60, 0.0 }
 0x6c0   :  { %825 = vadd.xlane.f32.xlu0 %v824_v62 }
 0x6c1   :  { %v823_v63 = vmul.f32 %v821_v61, %v821_v61 }
 0x6c3   :  { %v827_v19 = vsel %vm115_vm0, %v823_v63, 0.0 }
 0x6c4   :  { %828 = vadd.xlane.f32.xlu1 %v827_v19 }
 0x74d   :  { %v826_v8 = vpop.xlane.xlu0 %825 }
 0x74e   :  { %v830_v9 = vmul.f32 0.03125, %v826_v8 }
 0x750   :  { %v832_v10 = vadd.f32 1e-05, %v830_v9 }
 0x751   :  { %v829_v11 = vpop.xlane.xlu1 %828 }
 0x752   :  { %1432 = vrsqrt.f32 %v832_v10  ;;  %v831_v12 = vmul.f32 0.03125, %v829_v11 }
 0x754   :  { %v833_v13 = vadd.f32 1e-05, %v831_v12 }
 0x756   :  { %1434 = vrsqrt.f32 %v833_v13 }
 0x75c   :  { %v1433_v14 = vpop.eup %1432 }
 0x75d   :  { %v836_v16 = vmul.f32 %v1433_v14, %v820_v57 }
 0x75f   :  { %v838_v18 = vmul.f32 %v836_v16, %v83_v15 }
 0x760   :  { %v1435_v21 = vpop.eup %1434 }
 0x761   :  { %v837_v22 = vmul.f32 %v1435_v21, %v821_v61  ;;  %v840_v23 = vadd.f32 %v838_v18, %v84_v17 }
 0x763   :  { %v839_v26 = vmul.f32 %v837_v22, %v83_v15  ;;  %1271 = vmatprep.mubr.msk.f32.mxu0 %vm115_vm0, %v840_v23 }
 0x765   :  { %v841_v27 = vadd.f32 %v839_v26, %v84_v17 }
 0x767   :  { %1272 = vmatmul.mubr.msk.f32.vlgmr.msra.gmra.mrb[8].mxu0 %vm115_vm0, %v841_v27 }
 0x768   :  { %1404 = vmatpush3.bf16.msra.mxu0 %v1401_v7 }
 0x769   :  { %1406 = vmatprep.subr.bf16.mxu0 %v1405_v28 }
 0x76c   :  { %1408 = vmatpush3.bf16.msra.mxu0 %v1405_v28 }
 0x76d   :  { %1410 = vmatprep.subr.bf16.mxu0 %v1409_v31 }
 0x770   :  { %1412 = vmatpush3.bf16.msra.mxu0 %v1409_v31 }
 0x771   :  { %1414 = vmatprep.subr.bf16.mxu0 %v1413_v34 }
 0x774   :  { %1416 = vmatpush3.bf16.msra.mxu0 %v1413_v34 }
 0x83a   :  { %v1273_v36 = vpop.f32.mrb[8].mxu0 }
 0x83b   :  { %v924_v37 = vadd.f32 %v1273_v36, %v81_v35  ;;  %v918_v38 = vpop.f32.mrb[9].mxu0 }
 0x83c   :  { %v919_v40 = vadd.f32 %v918_v38, %v81_v35 }
 0x83d   :  { %v928_v42 = vmax.f32 %v924_v37, 0.0 }
 0x83e   :  { %v927_v41 = vmax.f32 %v919_v40, 0.0 }
 0x840   :  { %1290 = vmatprep.mubr.msk.f32.mxu0 %vm529_vm2, %v927_v41 }
 0x841   :  { %1291 = vmatmul.mubr.msk.f32.vlgmr.msra.gmra.mrb[10].mxu0 %vm529_vm2, %v928_v42 }
 0x914   :  { %v1292_v44 = vpop.f32.mrb[10].mxu0 }
 0x915   :  { %v1015_v45 = vadd.f32 %v1292_v44, %v82_v43  ;;  %v1009_v46 = vpop.f32.mrb[11].mxu0 }
 0x916   :  { %v1010_v47 = vadd.f32 %v1009_v46, %v82_v43 }
 0x917   :  { %v1019_v48 = vadd.f32 %v1015_v45, %v841_v27 }
 0x918   :  { %v1018_v49 = vadd.f32 %v1010_v47, %v840_v23 }
 0x919   :  { %v1023_v39 = vsel %vm115_vm0, %v1019_v48, 0.0 }
 0x91a   :  { %1024 = vadd.xlane.f32.xlu1 %v1023_v39  ;;  %v1020_v50 = vsel %vm115_vm0, %v1018_v49, 0.0 }
 0x91b   :  { %1021 = vadd.xlane.f32.xlu0 %v1020_v50 }
 0x9a7   :  { %v1025_v51 = vpop.xlane.xlu1 %1024 }
 0x9a8   :  { %v1027_v52 = vmul.f32 0.03125, %v1025_v51  ;;  %v1022_v53 = vpop.xlane.xlu0 %1021 }
 0x9a9   :  { %v1026_v54 = vmul.f32 0.03125, %v1022_v53 }
 0x9aa   :  { %v1029_v55 = vsub.f32 %v1019_v48, %v1027_v52 }
 0x9ab   :  { %v1028_v56 = vsub.f32 %v1018_v49, %v1026_v54 }
 0x9ac   :  { %v1031_v57 = vmul.f32 %v1029_v55, %v1029_v55 }
 0x9ad   :  { %v1030_v58 = vmul.f32 %v1028_v56, %v1028_v56 }
 0x9ae   :  { %v1035_v59 = vsel %vm115_vm0, %v1031_v57, 0.0 }
 0x9af   :  { %1036 = vadd.xlane.f32.xlu1 %v1035_v59  ;;  %v1032_v60 = vsel %vm115_vm0, %v1030_v58, 0.0 }
 0x9b0   :  { %1033 = vadd.xlane.f32.xlu0 %v1032_v60 }
 0xa3c   :  { %v1037_v61 = vpop.xlane.xlu1 %1036 }
 0xa3d   :  { %v1039_v62 = vmul.f32 0.03125, %v1037_v61  ;;  %v1034_v63 = vpop.xlane.xlu0 %1033 }
 0xa3e   :  { %v1038_v19 = vmul.f32 0.03125, %v1034_v63 }
 0xa3f   :  { %v1041_v0 = vadd.f32 1e-05, %v1039_v62 }
 0xa40   :  { %v1040_v20 = vadd.f32 1e-05, %v1038_v19 }
 0xa41   :  { %1436 = vrsqrt.f32 %v1041_v0 }
 0xa42   :  { %1438 = vrsqrt.f32 %v1040_v20 }
 0xa4b   :  { %v1437_v1 = vpop.eup %1436 }
 0xa4c   :  { %v1439_v3 = vpop.eup %1438  ;;  %v1045_v4 = vmul.f32 %v1437_v1, %v1029_v55 }
 0xa4d   :  { %v1044_v5 = vmul.f32 %v1439_v3, %v1028_v56 }
 0xa4e   :  { %v1047_v7 = vmul.f32 %v1045_v4, %v85_v2 }
 0xa4f   :  { %v1046_v8 = vmul.f32 %v1044_v5, %v85_v2 }
 0xa50   :  { %v1049_v9 = vadd.f32 %v1047_v7, %v86_v6 }
 0xa51   :  { %v1048_v10 = vadd.f32 %v1046_v8, %v86_v6 }
 0xa52   :  { %1051 = vst.msk [vmem:[#allocation8 + $0x8] sm:$0xff] %vm115_vm0, %v1049_v9 }
 0xa53   :  { %1050 = vst.msk [vmem:[#allocation8] sm:$0xff] %vm115_vm0, %v1048_v10 }
 0xa54   :  { %1517 = shalt.err (!%p1514_p0)
}
 0xa55   :  { %s1518_s19 = scalar_lea.hbm %s1956_s10, 256 }
 0xa56   :  { %p1519_p1 = scmp.ne.s32.totalorder %s1956_s10, %s1518_s19  ;;  %p1522_p2 = scmp.lt.u32.totalorder %s1518_s19, %s1956_s10 }
 0xa58   :  { %p1524_p3 = pnand %p1522_p2, %p1519_p1 }
 0xa5a   :  { %1527 = shalt.err (!%p1524_p3)
}
 0xa5b   :  { %1063 = dma.vmem_to_hbm [thread:$0]  %s1058_s9, 256, %s1956_s10, [#allocation4], %s1536_s25, %s1536_s25, %s1537_s26  }
 0xa5c   :  { %1532 = dma.done.wait [#allocation4], 256  }
 0xa5d   :  { %1533 = vsyncadd [#allocation4], 4294967040 }
 0xa5e   :  { %1067 = vsyncpa [#allocation3], 1 }
 0xa5f   :  { %1068 = vsyncpa [#allocation6], 1 }
 0xa60   :  { %1069 = vsyncpa [#allocation4], 1 }

</bundles_post_ra>
